<compile_context>
chip_gen: v6e
topology: v6e:2x2x1
jax: 0.10.0
libtpu: 0.0.40
codegen_flags: <defaults>
</compile_context>

<pallas_src>
import jax
import jax.numpy as jnp
from jax.experimental import pallas as pl
from jax.experimental.pallas import tpu as pltpu

_LANES = 128                    # vreg lane width (fast axis)
_TARGET_BLOCK_BYTES = 2 << 20   # ~2 MiB per operand block (85%+ of HBM roofline,
                                # 12 MiB total double-buffered footprint)
_SMALL_BYTES = 512 << 10        # below this: single full-array block, no grid


def _add_kernel(a_ref, b_ref, o_ref):
    # Pure element-wise add on a lane-dense block: full unmasked vreg ld/st,
    # no XLU work, no VMEM intermediates.
    o_ref[...] = a_ref[...] + b_ref[...]


def _sublanes_for(dtype) -> int:
    # Sub-32-bit dtypes pack along sublanes: f32 -> 8, bf16/f16 -> 16, int8/fp8 -> 32.
    itemsize = jnp.dtype(dtype).itemsize
    return max(8, 32 // itemsize)


def add_pallas(a: jax.Array, b: jax.Array) -> jax.Array:
    """Element-wise a + b via a lane-dense, tiled Pallas TPU kernel."""
    out_shape = jnp.broadcast_shapes(a.shape, b.shape)
    out_dtype = jnp.promote_types(a.dtype, b.dtype)

    # TODO(synk): if one operand were a genuine broadcast (scalar / (1,C,1,1)),
    # keep it small and broadcast inside the kernel instead of materializing it;
    # Add2 always adds two same-shaped feature maps, so that path is not needed.
    if a.dtype != out_dtype:
        a = a.astype(out_dtype)
    if b.dtype != out_dtype:
        b = b.astype(out_dtype)
    if a.shape != out_shape:
        a = jnp.broadcast_to(a, out_shape)
    if b.shape != out_shape:
        b = jnp.broadcast_to(b, out_shape)

    n = 1
    for d in out_shape:
        n *= d
    if n == 0:
        return jnp.zeros(out_shape, out_dtype)

    itemsize = jnp.dtype(out_dtype).itemsize
    cost = pl.CostEstimate(flops=n, transcendentals=0,
                           bytes_accessed=3 * n * itemsize)

    # ---- Small-input fast path: one full-array block, no grid, no padding. ----
    if n * itemsize <= _SMALL_BYTES:
        shape2d = (n // _LANES, _LANES) if n % _LANES == 0 else (1, n)
        out2 = pl.pallas_call(
            _add_kernel,
            out_shape=jax.ShapeDtypeStruct(shape2d, out_dtype),
            cost_estimate=cost,
        )(a.reshape(shape2d), b.reshape(shape2d))
        return out2.reshape(out_shape)

    # ---- Large-input path: lane-dense (rows, 128) slab, 1-D parallel grid. ----
    sublanes = _sublanes_for(out_dtype)
    rows = pl.cdiv(n, _LANES)
    rows_p = pl.cdiv(rows, sublanes) * sublanes   # pad rows to one (sublanes,128) tile
    n_p = rows_p * _LANES                         # pad <= sublanes*128 elements

    def to_slab(x):
        flat = x.reshape(-1)
        if n_p != n:
            flat = jnp.pad(flat, (0, n_p - n))
        return flat.reshape(rows_p, _LANES)

    # ~2 MiB per operand block; tile_rows is a dtype-aware sublane multiple so
    # every interior block is full unmasked vregs (4096 f32 / 8192 bf16 / 16384 i8).
    tile_rows = (_TARGET_BLOCK_BYTES // (_LANES * itemsize)) // sublanes * sublanes
    tile_rows = min(max(tile_rows, sublanes), rows_p)

    grid = (pl.cdiv(rows_p, tile_rows),)          # partial last block handled by Pallas
    block = pl.BlockSpec((tile_rows, _LANES), lambda i: (i, 0))

    out2 = pl.pallas_call(
        _add_kernel,
        out_shape=jax.ShapeDtypeStruct((rows_p, _LANES), out_dtype),
        grid=grid,
        in_specs=[block, block],
        out_specs=block,
        compiler_params=pltpu.CompilerParams(
            dimension_semantics=("parallel",)),
        cost_estimate=cost,
    )(to_slab(a), to_slab(b))

    out_flat = out2.reshape(-1)
    if n_p != n:
        out_flat = out_flat[:n]
    return out_flat.reshape(out_shape)


def add2_forward(x, index: int) -> jax.Array:
    """Pallas equivalent of Add2.forward: x = (a, (b0, b1)) -> a + x[1][index]."""
    if index not in (0, 1):
        raise ValueError("Add2 only supports index in {0, 1}")
    return add_pallas(x[0], x[1][index])


if __name__ == "__main__":
    key = jax.random.PRNGKey(0)
    k0, k1, k2 = jax.random.split(key, 3)

    # Module-scale shapes: batch=2, channels=4, spatial=16.
    N, C, H, W = 2, 4, 16, 16
    a = jax.random.normal(k0, (N, C, H, W), dtype=jnp.float32)
    b0 = jax.random.normal(k1, (N, C, H, W), dtype=jnp.float32)
    b1 = jax.random.normal(k2, (N, C, H, W), dtype=jnp.float32)
    x = (a, (b0, b1))

    out0 = jax.block_until_ready(add2_forward(x, index=0))
    out1 = jax.block_until_ready(add2_forward(x, index=1))
    assert out0.shape == (N, C, H, W), out0.shape
    assert out1.shape == (N, C, H, W), out1.shape
    assert jnp.allclose(out0, a + b0), "mismatch vs reference (index=0)"
    assert jnp.allclose(out1, a + b1), "mismatch vs reference (index=1)"

    # Also exercise the tiled (multi-step grid, partial last block) path ...
    big_a = jax.random.normal(k0, (2, 8, 256, 160), dtype=jnp.float32)  # 2.5 MiB
    big_b = jax.random.normal(k1, (2, 8, 256, 160), dtype=jnp.float32)
    big_o = jax.block_until_ready(add_pallas(big_a, big_b))
    assert jnp.allclose(big_o, big_a + big_b), "mismatch vs reference (tiled path)"

    # ... and the ragged small-input path (n not a multiple of 128).
    odd_a = jax.random.normal(k0, (3, 5, 17, 19), dtype=jnp.float32)
    odd_b = jax.random.normal(k1, (3, 5, 17, 19), dtype=jnp.float32)
    odd_o = jax.block_until_ready(add_pallas(odd_a, odd_b))
    assert jnp.allclose(odd_o, odd_a + odd_b), "mismatch vs reference (ragged path)"

    print("KERNEL_OK")
</pallas_src>

<mosaic_0001>
module attributes {stable_mosaic.version = 11 : i64} {
  func.func @_add_kernel(%arg0: memref<16x128xf32, #tpu.memory_space<vmem>>, %arg1: memref<16x128xf32, #tpu.memory_space<vmem>>, %arg2: memref<16x128xf32, #tpu.memory_space<vmem>>) attributes {dimension_semantics = [], scalar_prefetch = 0 : i64, scratch_operands = 0 : i64, tpu.core_type = #tpu.core_type<tc>} {
    %c0 = arith.constant 0 : index
    %c0_0 = arith.constant 0 : index
    %0 = vector.load %arg0[%c0, %c0_0] : memref<16x128xf32, #tpu.memory_space<vmem>>, vector<16x128xf32>
    %c0_1 = arith.constant 0 : index
    %c0_2 = arith.constant 0 : index
    %1 = vector.load %arg1[%c0_1, %c0_2] : memref<16x128xf32, #tpu.memory_space<vmem>>, vector<16x128xf32>
    %2 = arith.addf %0, %1 : vector<16x128xf32>
    %c0_3 = arith.constant 0 : index
    %c0_4 = arith.constant 0 : index
    %3 = vector.load %arg2[%c0_3, %c0_4] : memref<16x128xf32, #tpu.memory_space<vmem>>, vector<16x128xf32>
    tpu.vector_store %arg2[%c0_3, %c0_4], %2 {strides = array<i32>} : memref<16x128xf32, #tpu.memory_space<vmem>>, vector<16x128xf32>,
    return
  }
}

</mosaic_0001>

<bundles_post_ra>
// kernel: tpu_custom_call.1
= control target key start
LH: loop header
LB: loop body
LE: loop exit
PB: predicated region body
PF: predicated region fallthrough
CT: control target
= control target key end

     0   :  { %7 = vsyncpa [#allocation3], 0  ;;  %s175_s0 = inlined_call_operand.hbm [shape: f32[16,128], index: 0, kind: input, shape index: {}]   ;;  %s176_s1 = inlined_call_operand.hbm [shape: f32[16,128], index: 1, kind: input, shape index: {}]   ;;  %s177_s2 = inlined_call_operand.hbm [shape: f32[16,128], index: 2, kind: output, shape index: {}]  }
   0x1   :  { %8 = vsyncpa [#allocation6], 0 }
   0x2   :  { %9 = vsyncpa [#allocation4], 0  ;;  %s137_s9 = smov [#allocation2]  }
   0x3   :  { %s15_s10 = sshll.u32 %s137_s9, 4  ;;  %s16_s10 = int_to_ptr.vmem [resolvable:$true] %s15_s10 }
   0x4   :  { %s79_s11 = scalar_lea.vmem %s16_s10, 256  ;;  %p84_p1 = scmp.lt.s32.totalorder %s16_s10, %s16_s10 }
   0x5   :  { %p80_p0 = scmp.ne.s32.totalorder %s16_s10, %s79_s11  ;;  %p85_p2 = scmp.lt.s32.totalorder %s79_s11, %s79_s11 }
   0x7   :  { %p86_p3 = por %p85_p2, %p84_p1 }
   0x9   :  { %p87_p4 = pnand %p86_p3, %p80_p0 }
   0xb   :  { %90 = shalt.err (!%p87_p4)
}
   0xc   :  { %s138_s12 = smov 128   ;;  %s139_s13 = smov 8  }
   0xd   :  { %21 = dma.hbm_to_vmem [thread:$0]  %s175_s0, 256, %s16_s10, [#allocation3], %s138_s12, %s138_s12, %s139_s13  }
   0xe   :  { %s140_s16 = smov [#allocation5]  }
   0xf   :  { %s27_s17 = sshll.u32 %s140_s16, 4  ;;  %s28_s17 = int_to_ptr.vmem [resolvable:$true] %s27_s17 }
  0x10   :  { %s99_s18 = scalar_lea.vmem %s28_s17, 256  ;;  %p104_p6 = scmp.lt.s32.totalorder %s28_s17, %s28_s17 }
  0x11   :  { %p100_p5 = scmp.ne.s32.totalorder %s28_s17, %s99_s18  ;;  %p105_p7 = scmp.lt.s32.totalorder %s99_s18, %s99_s18 }
  0x13   :  { %p106_p8 = por %p105_p7, %p104_p6 }
  0x15   :  { %p107_p9 = pnand %p106_p8, %p100_p5 }
  0x17   :  { %110 = shalt.err (!%p107_p9)
}
  0x18   :  { %33 = dma.hbm_to_vmem [thread:$0]  %s176_s1, 256, %s28_s17, [#allocation6], %s138_s12, %s138_s12, %s139_s13  }
  0x19   :  { %131 = dma.done.wait [#allocation3], 256  }
  0x1a   :  { %132 = vsyncadd [#allocation3], 4294967040 }
  0x1b   :  { %133 = dma.done.wait [#allocation6], 256  }
  0x1c   :  { %134 = vsyncadd [#allocation6], 4294967040  ;;  %s141_s0 = smov [#allocation7]   ;;  %v40_v0 = vld [vmem:[#allocation2] sm:$0xff]  ;;  %v42_v1 = vld [vmem:[#allocation5] sm:$0xff] }
  0x1d   :  { %s53_s21 = sshll.u32 %s141_s0, 4  ;;  %v41_v2 = vld [vmem:[#allocation2 + $0x8] sm:$0xff]  ;;  %v44_v3 = vadd.f32 %v42_v1, %v40_v0  ;;  %v43_v4 = vld [vmem:[#allocation5 + $0x8] sm:$0xff]  ;;  %s54_s21 = int_to_ptr.vmem [resolvable:$true] %s53_s21 }
  0x1e   :  { %v45_v5 = vadd.f32 %v43_v4, %v41_v2  ;;  %s111_s22 = scalar_lea.vmem %s54_s21, 256  ;;  %p116_p11 = scmp.lt.s32.totalorder %s54_s21, %s54_s21 }
  0x1f   :  { %46 = vst [vmem:[#allocation7] sm:$0xff] %v44_v3  ;;  %p112_p10 = scmp.ne.s32.totalorder %s54_s21, %s111_s22  ;;  %p117_p12 = scmp.lt.s32.totalorder %s111_s22, %s111_s22 }
  0x20   :  { %47 = vst [vmem:[#allocation7 + $0x8] sm:$0xff] %v45_v5 }
  0x21   :  { %p118_p13 = por %p117_p12, %p116_p11 }
  0x23   :  { %p119_p0 = pnand %p118_p13, %p112_p10 }
  0x25   :  { %122 = shalt.err (!%p119_p0)
}
  0x26   :  { %59 = dma.vmem_to_hbm [thread:$0]  %s54_s21, 256, %s177_s2, [#allocation4], %s138_s12, %s138_s12, %s139_s13  }
  0x27   :  { %135 = dma.done.wait [#allocation4], 256  }
  0x28   :  { %136 = vsyncadd [#allocation4], 4294967040 }
  0x29   :  { %63 = vsyncpa [#allocation3], 1 }
  0x2a   :  { %64 = vsyncpa [#allocation6], 1 }
  0x2b   :  { %65 = vsyncpa [#allocation4], 1 }

</bundles_post_ra>
